<compile_context>
chip_gen: v5e
topology: v5e:2x2
jax: 0.10.0
libtpu: 0.0.40
codegen_flags: <defaults>
</compile_context>

<pallas_src>
import functools
import warnings
from abc import ABCMeta, abstractmethod
from collections import OrderedDict

import jax
import jax.numpy as jnp
from jax import lax
from jax.experimental import pallas as pl
from jax.experimental.pallas import tpu as pltpu


_LANE = 128
_SMALL_N = 64 * 1024               # below this, XLA's fused reduce beats a kernel launch
_BLOCK_BYTES = 8 * 1024 * 1024     # ~8 MiB f32 block footprint; 2x double-buffer fits all gens
_VMEM_LIMIT = 48 * 1024 * 1024     # explicit scoped-VMEM budget (<= physical on v5e/v6e/v7x)
_NUM_CORES = 2                     # v7x megacore split; harmless (sequential) on 1-TC chips
# TODO(synk): query the actual TensorCore count (pltpu.get_tpu_info) instead of
# hard-coding 2; on 1-TC chips the split is just two sequential passes.


# --------------------------------------------------------------------------
# Pallas reduction kernel: streaming sum with a per-core (8,128) accumulator.
# --------------------------------------------------------------------------
def _block_sum(x, block_rows):
    """(block_rows, 128) f32 -> (8, 128) partial sums.

    When block_rows % 8 == 0 this is pure sublane-aligned VALU vreg adds (no
    per-step cross-sublane XLU reduce).  The other case only occurs for a
    single full-array block, where one cross-sublane reduce is padded to (8,128).
    """
    if block_rows % 8 == 0:
        return x.reshape(block_rows // 8, 8, _LANE).sum(axis=0)
    s = jnp.sum(x, axis=0, keepdims=True)                       # (1, 128)
    sub = lax.broadcasted_iota(jnp.int32, (8, 1), 0)
    return jnp.where(sub == 0, s, jnp.float32(0.0))             # (8, 128)


def _sum_kernel(x_ref, o_ref, *, block_rows, rows, bpc, needs_mask):
    c = pl.program_id(0)          # core-split axis ("parallel")
    i = pl.program_id(1)          # streaming/reduction axis ("arbitrary")

    @pl.when(i == 0)
    def _init():
        o_ref[...] = jnp.zeros_like(o_ref)   # output block doubles as accumulator

    # Native-dtype DMA, upcast on the VPU inside the kernel.
    x = x_ref[...].astype(jnp.float32)                          # (block_rows, 128)

    if not needs_mask:
        o_ref[...] += _block_sum(x, block_rows)[None]
    else:
        gb = c * bpc + i                      # logical (unclamped) global block index
        full_blocks = rows // block_rows      # blocks entirely inside the array

        @pl.when(gb < full_blocks)            # interior blocks: no mask ops at all
        def _fast():
            o_ref[...] += _block_sum(x, block_rows)[None]

        @pl.when(gb >= full_blocks)           # partial or fully out-of-range block
        def _masked():
            row0 = gb * block_rows
            ridx = row0 + lax.broadcasted_iota(jnp.int32, (block_rows, 1), 0)
            # Select (NOT multiply-by-mask): garbage rows may hold NaN/Inf.
            xm = jnp.where(ridx < rows, x, jnp.float32(0.0))
            o_ref[...] += _block_sum(xm, block_rows)[None]


def pallas_mean(x, *, block_bytes=_BLOCK_BYTES, min_size=_SMALL_N):
    """torch.Tensor.mean() equivalent; the reduction runs in a Pallas TPU kernel."""
    x = jnp.asarray(x)
    n = x.size
    if n == 0:
        # torch .mean() on an empty tensor is nan; also avoids a zero-size grid.
        return jnp.float32(jnp.nan)

    xf = x.reshape(-1)                       # free bitcast view, native dtype
    rows = n // _LANE
    if n < min_size or rows == 0:
        # Tiny tensors (the real _parse_losses hot path): XLA fused reduce wins.
        return jnp.mean(x.astype(jnp.float32))

    rem = n - rows * _LANE
    if rem:
        # TODO(synk): the 128-aligned prefix slice still materializes one ~n-element
        # copy in XLA; a fully copy-free unaligned path needs a 1-D masked-DMA kernel.
        main = xf[: rows * _LANE]
        tail_sum = jnp.sum(xf[rows * _LANE:].astype(jnp.float32))   # <128 elems, trivial
    else:
        main = xf
        tail_sum = jnp.float32(0.0)
    x2 = main.reshape(rows, _LANE)           # (rows, 128), lane-dense, no copy

    itemsize = jnp.dtype(x2.dtype).itemsize
    sublane = {1: 32, 2: 16}.get(itemsize, 8)       # native second-minor tile per dtype
    eff_itemsize = max(itemsize, 4)                  # budget the in-kernel f32 cast temp
    max_rows = max(sublane, block_bytes // (_LANE * eff_itemsize))
    max_rows -= max_rows % sublane
    if rows <= max_rows:
        block_rows = rows                            # one full-array block (always legal)
    else:
        block_rows = max_rows                        # multiple of sublane (and of 8)
    num_blocks = pl.cdiv(rows, block_rows)
    num_cores = _NUM_CORES if num_blocks >= 2 else 1
    bpc = pl.cdiv(num_blocks, num_cores)             # blocks per core
    needs_mask = (num_cores * bpc * block_rows) != rows

    kernel = functools.partial(_sum_kernel, block_rows=block_rows, rows=rows,
                               bpc=bpc, needs_mask=needs_mask)

    partials = pl.pallas_call(
        kernel,
        out_shape=jax.ShapeDtypeStruct((num_cores, 8, _LANE), jnp.float32),
        grid_spec=pltpu.PrefetchScalarGridSpec(
            num_scalar_prefetch=0,
            grid=(num_cores, bpc),
            in_specs=[pl.BlockSpec(
                (block_rows, _LANE),
                # clamp: out-of-range logical blocks re-read the last valid block
                # (their contribution is fully masked to zero in-kernel).
                lambda c, i: (jnp.minimum(c * bpc + i, num_blocks - 1), 0))],
            out_specs=pl.BlockSpec((1, 8, _LANE), lambda c, i: (c, 0, 0))),
        compiler_params=pltpu.CompilerParams(
            dimension_semantics=("parallel", "arbitrary"),
            vmem_limit_bytes=_VMEM_LIMIT),
    )(x2)

    # Tiny fused XLA epilogue: sum the per-core (8,128) partials, add the tail, divide.
    total = jnp.sum(partials) + tail_sum
    return total / jnp.float32(n)


# --------------------------------------------------------------------------
# BaseDetector: faithful port of the PyTorch control flow.
# --------------------------------------------------------------------------
class BaseDetector(metaclass=ABCMeta):
    """Base class for detectors (JAX/Pallas port)."""

    def __init__(self):
        self.fp16_enabled = False

    # ---- capability properties -----------------------------------------
    @property
    def with_neck(self):
        return hasattr(self, 'neck') and self.neck is not None

    @property
    def with_shared_head(self):
        return hasattr(self, 'roi_head') and self.roi_head.with_shared_head

    @property
    def with_bbox(self):
        return (hasattr(self, 'roi_head') and self.roi_head.with_bbox) or \
               (hasattr(self, 'bbox_head') and self.bbox_head is not None)

    @property
    def with_mask(self):
        return (hasattr(self, 'roi_head') and self.roi_head.with_mask) or \
               (hasattr(self, 'mask_head') and self.mask_head is not None)

    # ---- abstract hooks --------------------------------------------------
    @abstractmethod
    def extract_feat(self, imgs):
        pass

    def extract_feats(self, imgs):
        assert isinstance(imgs, list)
        return [self.extract_feat(img) for img in imgs]

    @abstractmethod
    def simple_test(self, img, img_metas, **kwargs):
        pass

    @abstractmethod
    def aug_test(self, imgs, img_metas, **kwargs):
        pass

    # ---- train / test dispatch ------------------------------------------
    def forward_train(self, imgs, img_metas, **kwargs):
        batch_input_shape = tuple(imgs[0].shape[-2:])
        for img_meta in img_metas:
            img_meta['batch_input_shape'] = batch_input_shape

    def forward_test(self, imgs, img_metas, **kwargs):
        for var, name in [(imgs, 'imgs'), (img_metas, 'img_metas')]:
            if not isinstance(var, list):
                raise TypeError(f'{name} must be a list, but got {type(var)}')
        num_augs = len(imgs)
        if num_augs != len(img_metas):
            raise ValueError(
                f'num of augmentations ({len(imgs)}) != '
                f'num of image meta ({len(img_metas)})')
        for img, img_meta in zip(imgs, img_metas):
            batch_size = len(img_meta)
            for img_id in range(batch_size):
                img_meta[img_id]['batch_input_shape'] = tuple(img.shape[-2:])
        if num_augs == 1:
            if 'proposals' in kwargs:
                kwargs['proposals'] = kwargs['proposals'][0]
            return self.simple_test(imgs[0], img_metas[0], **kwargs)
        else:
            assert imgs[0].shape[0] == 1, (
                'aug test does not support inference with batch size '
                f'{imgs[0].shape[0]}')
            assert 'proposals' not in kwargs
            return self.aug_test(imgs, img_metas, **kwargs)

    def forward(self, img, img_metas, return_loss=True, **kwargs):
        if return_loss:
            return self.forward_train(img, img_metas, **kwargs)
        else:
            return self.forward_test(img, img_metas, **kwargs)

    def __call__(self, img, img_metas, return_loss=True, **kwargs):
        return self.forward(img, img_metas, return_loss=return_loss, **kwargs)

    # ---- loss parsing (the reduction hot path) ---------------------------
    @staticmethod
    def _mean_entry(name, value):
        if value.size == 0:
            warnings.warn(f"loss entry '{name}' is empty; its mean is NaN and will "
                          "propagate into the summed total loss.")
        return pallas_mean(value)

    def _parse_losses(self, losses):
        # TODO(synk): a fully-batched variant (concat all flattened losses + one
        # pallas_call emitting one partial sum per loss) would collapse the per-entry
        # dispatches into a single launch; with _SMALL_N=64K the typical detector-sized
        # entries already take XLA's fused reduce, so this is kept simple.
        log_vars = OrderedDict()
        for loss_name, loss_value in losses.items():
            if isinstance(loss_value, jax.Array):
                log_vars[loss_name] = self._mean_entry(loss_name, loss_value)
            elif isinstance(loss_value, list):
                log_vars[loss_name] = sum(
                    self._mean_entry(loss_name, v) for v in loss_value)
            else:
                raise TypeError(
                    f'{loss_name} is not a tensor or list of tensors')

        loss = sum(_value for _key, _value in log_vars.items()
                   if 'loss' in _key)
        log_vars['loss'] = loss

        # TODO(synk): torch.distributed all_reduce averaging has no equivalent in this
        # single-host setting; values are reported as-is.
        # One batched device->host transfer instead of a blocking sync per loss.
        names = list(log_vars.keys())
        host_vals = jax.device_get(
            jnp.stack([jnp.asarray(log_vars[k], jnp.float32) for k in names]))
        for k, v in zip(names, host_vals):
            log_vars[k] = float(v)
        return loss, log_vars

    def train_step(self, data, optimizer):
        losses = self(**data)
        loss, log_vars = self._parse_losses(losses)
        outputs = dict(loss=loss, log_vars=log_vars,
                       num_samples=len(data['img_metas']))
        return outputs

    def val_step(self, data, optimizer):
        losses = self(**data)
        loss, log_vars = self._parse_losses(losses)
        outputs = dict(loss=loss, log_vars=log_vars,
                       num_samples=len(data['img_metas']))
        return outputs


# Minimal concrete subclass purely to exercise the base-class forward paths
# (the real SCRFD subclass supplies backbone/neck/head; none exist in the
# base module, so no weights are created here).
class _DemoDetector(BaseDetector):
    def extract_feat(self, imgs):
        return imgs

    def simple_test(self, img, img_metas, **kwargs):
        # Per-image scalar summary computed with the mean reduction.
        return [pallas_mean(img[i]) for i in range(img.shape[0])]

    def aug_test(self, imgs, img_metas, **kwargs):
        raise NotImplementedError


if __name__ == "__main__":
    key = jax.random.PRNGKey(0)
    k1, k2, k3, k4, k5, k6, k7, k8 = jax.random.split(key, 8)

    # Small NCHW image batch consistent with the detector interface.
    img = jax.random.normal(k1, (2, 4, 16, 16), dtype=jnp.float32)
    det = _DemoDetector()

    # ---- forward(return_loss=True): meta-data plumbing -------------------
    img_metas_train = [dict() for _ in range(2)]
    det(img, img_metas_train, return_loss=True)
    assert all(m['batch_input_shape'] == (16, 16) for m in img_metas_train)

    # ---- forward(return_loss=False): test-time dispatch ------------------
    img_metas_test = [[dict() for _ in range(2)]]
    test_out = det([img], img_metas_test, return_loss=False)
    test_out = [jax.block_until_ready(t) for t in test_out]
    assert all(m['batch_input_shape'] == (16, 16) for m in img_metas_test[0])

    # ---- _parse_losses on detector-sized (small) losses -------------------
    losses = OrderedDict(
        loss_cls=jax.random.normal(k2, (2, 4, 16, 16), dtype=jnp.float32) ** 2,
        loss_bbox=[jax.random.normal(k3, (2, 100, 4), dtype=jnp.float32),
                   jax.random.normal(k4, (2, 100, 4), dtype=jnp.float32)],
        acc=jnp.abs(img),
    )
    loss, log_vars = det._parse_losses(losses)
    loss = jax.block_until_ready(loss)
    ref = (jnp.mean(losses['loss_cls'])
           + jnp.mean(losses['loss_bbox'][0])
           + jnp.mean(losses['loss_bbox'][1]))
    assert abs(float(loss) - float(ref)) < 1e-5
    assert abs(log_vars['acc'] - float(jnp.mean(losses['acc']))) < 1e-5
    assert abs(log_vars['loss'] - float(ref)) < 1e-5

    # ---- Pallas kernel code-path checks -----------------------------------
    # (a) multi-block grid, 2-way core split, partial (masked) last block
    xa = jax.random.normal(k5, (1, 3, 40, 128), dtype=jnp.float32)
    got = pallas_mean(xa, block_bytes=16 * 1024, min_size=0)
    assert abs(float(got) - float(jnp.mean(xa))) < 1e-5
    # (b) odd block count -> one fully out-of-range (clamped + masked) block
    got = pallas_mean(xa, block_bytes=20 * 1024, min_size=0)
    assert abs(float(got) - float(jnp.mean(xa))) < 1e-5
    # (c) non-128-aligned element count (aligned prefix in-kernel + tiny tail sum)
    xb = jax.random.normal(k6, (5, 7, 37), dtype=jnp.float32)
    got = pallas_mean(xb, min_size=0)
    assert abs(float(got) - float(jnp.mean(xb))) < 1e-5
    # (d) bf16 input, in-kernel cast to f32
    xc = jax.random.normal(k7, (16, 256), dtype=jnp.float32).astype(jnp.bfloat16)
    got = pallas_mean(xc, min_size=0)
    assert abs(float(got) - float(jnp.mean(xc.astype(jnp.float32)))) < 1e-3
    # (e) default dispatch above the small-size threshold
    #     (single block, rows not a multiple of 8, non-aligned tail)
    xd = jax.random.normal(k8, (301, 257), dtype=jnp.float32)
    got = pallas_mean(xd)
    assert abs(float(got) - float(jnp.mean(xd))) < 1e-5
    jax.block_until_ready(got)

    print("KERNEL_OK")
</pallas_src>

<mosaic_0001>
module attributes {stable_mosaic.version = 11 : i64} {
  func.func @_sum_kernel(%arg0: i32, %arg1: i32, %arg2: memref<32x128xf32, #tpu.memory_space<vmem>>, %arg3: memref<1x8x128xf32, #tpu.memory_space<vmem>>) attributes {dimension_semantics = [#tpu.dimension_semantics<parallel>, #tpu.dimension_semantics<arbitrary>], iteration_bounds = array<i64: 2, 2>, scalar_prefetch = 0 : i64, scratch_operands = 0 : i64, tpu.core_type = #tpu.core_type<tc>, window_params = [{transform_indices = @transform_0, window_bounds = array<i64: 32, 128>}, {transform_indices = @transform_1, window_bounds = array<i64: 1, 8, 128>}]} {
    %c0_i32 = arith.constant 0 : i32
    %0 = arith.cmpi eq, %arg1, %c0_i32 : i32
    %1 = arith.extui %0 : i1 to i32
    %c0_i32_0 = arith.constant 0 : i32
    %2 = arith.cmpi ne, %1, %c0_i32_0 : i32
    scf.if %2 {
      %cst = arith.constant 0.000000e+00 : f32
      %12 = vector.broadcast %cst : f32 to vector<1x8x128xf32>
      %c0_5 = arith.constant 0 : index
      %c0_6 = arith.constant 0 : index
      %c0_7 = arith.constant 0 : index
      %13 = vector.load %arg3[%c0_5, %c0_6, %c0_7] : memref<1x8x128xf32, #tpu.memory_space<vmem>>, vector<1x8x128xf32>
      tpu.vector_store %arg3[%c0_5, %c0_6, %c0_7], %12 {strides = array<i32>} : memref<1x8x128xf32, #tpu.memory_space<vmem>>, vector<1x8x128xf32>,
    } else {
    }
    %c0 = arith.constant 0 : index
    %c0_1 = arith.constant 0 : index
    %3 = vector.load %arg2[%c0, %c0_1] : memref<32x128xf32, #tpu.memory_space<vmem>>, vector<32x128xf32>
    %c2_i32 = arith.constant 2 : i32
    %4 = arith.muli %arg0, %c2_i32 : i32
    %5 = arith.addi %4, %arg1 : i32
    %c3_i32 = arith.constant 3 : i32
    %6 = arith.cmpi slt, %5, %c3_i32 : i32
    %7 = arith.extui %6 : i1 to i32
    %c0_i32_2 = arith.constant 0 : i32
    %8 = arith.cmpi ne, %7, %c0_i32_2 : i32
    scf.if %8 {
      %c0_5 = arith.constant 0 : index
      %c0_6 = arith.constant 0 : index
      %c0_7 = arith.constant 0 : index
      %12 = vector.load %arg3[%c0_5, %c0_6, %c0_7] : memref<1x8x128xf32, #tpu.memory_space<vmem>>, vector<1x8x128xf32>
      %13 = vector.shape_cast %3 : vector<32x128xf32> to vector<4x8x128xf32>
      %cst = arith.constant dense<0.000000e+00> : vector<8x128xf32>
      %14 = vector.multi_reduction <add>, %13, %cst [0] : vector<4x8x128xf32> to vector<8x128xf32>
      %15 = vector.shape_cast %14 : vector<8x128xf32> to vector<1x8x128xf32>
      %16 = arith.addf %12, %15 : vector<1x8x128xf32>
      %c0_8 = arith.constant 0 : index
      %c0_9 = arith.constant 0 : index
      %c0_10 = arith.constant 0 : index
      %17 = vector.load %arg3[%c0_8, %c0_9, %c0_10] : memref<1x8x128xf32, #tpu.memory_space<vmem>>, vector<1x8x128xf32>
      tpu.vector_store %arg3[%c0_8, %c0_9, %c0_10], %16 {strides = array<i32>} : memref<1x8x128xf32, #tpu.memory_space<vmem>>, vector<1x8x128xf32>,
    } else {
    }
    %c3_i32_3 = arith.constant 3 : i32
    %9 = arith.cmpi sge, %5, %c3_i32_3 : i32
    %10 = arith.extui %9 : i1 to i32
    %c0_i32_4 = arith.constant 0 : i32
    %11 = arith.cmpi ne, %10, %c0_i32_4 : i32
    scf.if %11 {
      %c32_i32 = arith.constant 32 : i32
      %12 = arith.muli %5, %c32_i32 : i32
      %13 = tpu.iota {dimensions = array<i32: 0>} : vector<32x1xi32>
      %14 = vector.broadcast %12 : i32 to vector<32x1xi32>
      %15 = arith.addi %14, %13 : vector<32x1xi32>
      %c120_i32 = arith.constant 120 : i32
      %16 = vector.broadcast %c120_i32 : i32 to vector<32x1xi32>
      %17 = arith.cmpi slt, %15, %16 : vector<32x1xi32>
      %cst = arith.constant 0.000000e+00 : f32
      %18 = vector.shape_cast %17 : vector<32x1xi1> to vector<32x1xi1>
      %19 = vector.broadcast %18 : vector<32x1xi1> to vector<32x128xi1>
      %20 = vector.broadcast %cst : f32 to vector<32x128xf32>
      %21 = arith.select %19, %3, %20 : vector<32x128xi1>, vector<32x128xf32>
      %c0_5 = arith.constant 0 : index
      %c0_6 = arith.constant 0 : index
      %c0_7 = arith.constant 0 : index
      %22 = vector.load %arg3[%c0_5, %c0_6, %c0_7] : memref<1x8x128xf32, #tpu.memory_space<vmem>>, vector<1x8x128xf32>
      %23 = vector.shape_cast %21 : vector<32x128xf32> to vector<4x8x128xf32>
      %cst_8 = arith.constant dense<0.000000e+00> : vector<8x128xf32>
      %24 = vector.multi_reduction <add>, %23, %cst_8 [0] : vector<4x8x128xf32> to vector<8x128xf32>
      %25 = vector.shape_cast %24 : vector<8x128xf32> to vector<1x8x128xf32>
      %26 = arith.addf %22, %25 : vector<1x8x128xf32>
      %c0_9 = arith.constant 0 : index
      %c0_10 = arith.constant 0 : index
      %c0_11 = arith.constant 0 : index
      %27 = vector.load %arg3[%c0_9, %c0_10, %c0_11] : memref<1x8x128xf32, #tpu.memory_space<vmem>>, vector<1x8x128xf32>
      tpu.vector_store %arg3[%c0_9, %c0_10, %c0_11], %26 {strides = array<i32>} : memref<1x8x128xf32, #tpu.memory_space<vmem>>, vector<1x8x128xf32>,
    } else {
    }
    return
  }
  func.func @transform_0(%arg0: i32, %arg1: i32) -> (i32, i32) {
    %c2_i32 = arith.constant 2 : i32
    %0 = arith.muli %arg0, %c2_i32 : i32
    %1 = arith.addi %0, %arg1 : i32
    %c3_i32 = arith.constant 3 : i32
    %2 = arith.minsi %1, %c3_i32 : i32
    %c0_i32 = arith.constant 0 : i32
    %c0_i32_0 = arith.constant 0 : i32
    return %2, %c0_i32 : i32, i32
  }
  func.func @transform_1(%arg0: i32, %arg1: i32) -> (i32, i32, i32) {
    %c0_i32 = arith.constant 0 : i32
    %c0_i32_0 = arith.constant 0 : i32
    %c0_i32_1 = arith.constant 0 : i32
    return %arg0, %c0_i32, %c0_i32_0 : i32, i32, i32
  }
}

</mosaic_0001>

<bundles_post_ra>
// kernel: tpu_custom_call.1
= control target key start
LH: loop header
LB: loop body
LE: loop exit
PB: predicated region body
PF: predicated region fallthrough
CT: control target
= control target key end

     0   :  { %6 = vsyncpa [#allocation3], 0  ;;  %s866_s0 = inlined_call_operand.hbm [shape: f32[120,128], index: 0, kind: input, shape index: {}]   ;;  %s867_s1 = inlined_call_operand.hbm [shape: f32[2,8,128], index: 1, kind: output, shape index: {}]  }
   0x1   :  { %8 = vsyncpa [#allocation3 + $0x1], 0 }
   0x2   :  { %9 = vsyncpa [#allocation4], 0 }
   0x3   :  { %11 = vsyncpa [#allocation4 + $0x1], 0  ;;  %s635_s6 = smov 0   ;;  %s637_s7 = smov 0  }
   0x4   :  { %s639_s8 = smov 0   ;;  %s641_s9 = smov 0  }
   0x5   :  { %s643_s10 = smov 0   ;;  %s645_s11 = smov 0  }
   0x6   :  { %s647_s12 = smov 0   ;;  %s649_s13 = smov 0  }
   0x7   :  { %s651_s14 = smov 0   ;;  %s653_s15 = smov 0  }
   0x8   :  { %s655_s16 = smov 0  }
   0x9 LB: > { %871 = sst [smem:[#allocation8_spill]] %s615_s15  ;;  %s332_s17 = sadd.s32 4294967295, %s619_s16   ;;  %s619_s16 = sphi %s655_s16, %s17_s16   ;;  %s615_s15 = sphi %s653_s15, %s881_s15   ;;  %s611_s14 = sphi %s651_s14, %s889_s14   ;;  %s607_s13 = sphi %s649_s13, %s879_s13   ;;  %s603_s12 = sphi %s647_s12, %s888_s12   ;;  %s599_s11 = sphi %s645_s11, %s887_s11   ;;  %s595_s10 = sphi %s643_s10, %s886_s10   ;;  %s591_s9 = sphi %s641_s9, %s885_s9   ;;  %s587_s8 = sphi %s639_s8, %s884_s8   ;;  %s583_s7 = sphi %s637_s7, %s883_s7   ;;  %s579_s6 = sphi %s635_s6, %s882_s6  }
   0xa   : > { %s333_s18 = sadd.s32 4294967294, %s619_s16   ;;  %s26_s19 = sadd.s32 1, %s611_s14 }
   0xb   : > { %s29_s20 = sadd.s32 1, %s615_s15  ;;  %p27_p0 = scmp.ge.s32.totalorder %s26_s19, 2 }
   0xc   : > { %s334_s21 = sshll.u32 %s615_s15, 1  ;;  %s44_s23 = sadd.s32 1, %s599_s11 }
   0xd   : > { %s34_s22 = sadd.s32 %s611_s14, %s334_s21  ;;  %s891_s19 = smov (%p27_p0, %s26_s19), 0 }
   0xe   : > { %872 = sst [smem:[#allocation9_spill]] %s891_s19  ;;  %s893_s20 = smov (!%p27_p0, %s29_s20), %s615_s15 }
   0xf   : > { %p35_p1 = scmp.lt.s32.totalorder %s34_s22, 3  ;;  %p51_p2 = scmp.ne.s32.totalorder %s599_s11, %s595_s10 }
  0x10   : > { %p31_p3 = scmp.ge.s32.totalorder %s893_s20, 2  ;;  %p52_p4 = scmp.eq.s32.totalorder %s619_s16, 0 }
  0x11   : > { %s895_s22 = smov (!%p35_p1, %s34_s22), 3  ;;  %p57_p6 = scmp.ne.s32.totalorder %s595_s10, %s591_s9 }
  0x12   : > { %s897_s20 = smov (%p31_p3, %s893_s20), 0  ;;  %p707_p5 = por %p52_p4, %p51_p2 }
  0x13   : > { %873 = sst [smem:[#allocation10_spill]] %s897_s20  ;;  %s335_s25 = sshll.u32 %s897_s20, 1 }
  0x14   : > { %p58_p7 = scmp.eq.s32.totalorder %s332_s17, 0  ;;  %s38_s26 = sadd.s32 %s335_s25, %s891_s19 }
  0x15   : > { %s67_s27 = ssub.s32 %s615_s15, %s897_s20  ;;  %p39_p8 = scmp.lt.s32.totalorder %s38_s26, 3 }
  0x16   : > { %p719_p9 = por %p58_p7, %p57_p6  ;;  %p68_p10 = scmp.eq.s32.totalorder %s67_s27, 0 }
  0x17   : > { %s70_s29 = sadd.s32 1, %s587_s8  ;;  %s899_s26 = smov (!%p39_p8, %s38_s26), 3 }
  0x18   : > { %s725_s30 = scalar_select %p68_p10, %s587_s8, %s70_s29  }
  0x19   : > { %s41_s2 = ssub.s32 %s895_s22, %s899_s26  ;;  %p80_p11 = scmp.ne.s32.totalorder %s587_s8, %s583_s7 }
  0x1a   : > { %p42_p12 = scmp.eq.s32.totalorder %s41_s2, 0  ;;  %p81_p13 = scmp.eq.s32.totalorder %s332_s17, 3 }
  0x1b   : > { %p86_p0 = scmp.ne.s32.totalorder %s583_s7, %s579_s6  ;;  %p87_p1 = scmp.eq.s32.totalorder %s333_s18, 3 }
  0x1c   : > { %s737_s3 = scalar_select %p42_p12, %s599_s11, %s44_s23  }
  0x1d   : > { %p739_p2 = por %p81_p13, %p80_p11  ;;  %p743_p3 = por %p87_p1, %p86_p0 }
  0x1e   : > { %p337_p4 = scmp.ge.s32.totalorder %s619_s16, 4 }
  0x20   : > { %103 = sbr.rel (%p337_p4) target bundleno = 73 (0x49), region = 16 }
  0x25   : > { %106 = sbr.rel (!%p707_p5) target bundleno = 73 (0x49), region = 20  ;;  %s107_s9 = sand.u32 (%p707_p5), 1, %s599_s11  }
  0x26   : > { %s340_s17 = sshll.u32 (%p707_p5), %s895_s22, 2  ;;  %s338_s18 = sshll.u32 (%p707_p5), %s107_s9, 5 }
  0x27   : > { %s117_s21 = ssub.s32 (%p707_p5), 15, %s340_s17  ;;  %s755_s27 = scalar_lea.sflag (%p707_p5), [#allocation3], %s107_s9 }
  0x28   : > { %p118_p6 = scmp.lt.s32.totalorder (%p707_p5), %s117_s21, 4  ;;  %s111_s29 = scalar_lea.vmem (%p707_p5), [#allocation2], %s338_s18 }
  0x2a   : > { %s901_s21 = smov (!%p118_p6, %s117_s21), 4 }
  0x2b   : > { %s341_s23 = sshll.u32 %s901_s21, 3 }
  0x2c   : > { %s121_s25 = ssub.s32 32, %s341_s23 }
  0x2d   : > { %s122_s26 = sshll.u32 %s121_s25, 4 }
  0x2e   : > { %123 = vsyncadd %s755_s27, %s122_s26  ;;  %p758_p5 = scmp.ne.s32.totalorder %s341_s23, 0  ;;  %s358_s2 = sshll.u32 %s895_s22, 5 }
  0x2f   : > { %s126_s19 = scalar_lea.hbm %s866_s0, %s358_s2  ;;  %s766_s15 = sshll.u32 %s111_s29, 4  ;;  %s131_s15 = int_to_ptr.vmem [resolvable:$true] %s766_s15 }
  0x30   : > { %s128_s9 = sshll.u32 %s126_s19, 4  ;;  %s345_s18 = sshll.u32 %s901_s21, 7  ;;  %s769_s9 = int_to_ptr.hbm [resolvable:$true] %s128_s9 }
  0x31   : > { %s458_s25 = sshra.s32 %s769_s9, 4  ;;  %s460_s23 = sshrl.u32 %s345_s18, 4  ;;  %s459_s25 = int_to_ptr.hbm [resolvable:$true] %s458_s25 }
  0x32   : > { %s465_s26 = scalar_lea.hbm %s459_s25, %s460_s23  ;;  %s469_s29 = scalar_lea.hbm %s866_s0, 120 }
  0x33   : > { %p466_p7 = scmp.ne.s32.totalorder %s459_s25, %s465_s26  ;;  %p471_p11 = scmp.lt.s32.totalorder %s469_s29, %s465_s26 }
  0x35   : > { %p467_p8 = pnand %p466_p7, %p758_p5 }
  0x37   : > { %p468_p10 = pneg %p467_p8 }
  0x39   : > { %p473_p12 = pnand %p471_p11, %p468_p10 }
  0x3b   : > { %476 = shalt.err (!%p473_p12)
}
  0x3c   : > { %s477_s19 = sshra.s32 %s131_s15, 4  ;;  %s621_s17 = smov [#allocation2]   ;;  %s478_s19 = int_to_ptr.vmem [resolvable:$true] %s477_s19 }
  0x3d   : > { %s484_s2 = scalar_lea.vmem %s478_s19, %s460_s23  ;;  %s488_s25 = scalar_lea.vmem %s621_s17, 64 }
  0x3e   : > { %p485_p13 = scmp.ne.s32.totalorder %s478_s19, %s484_s2  ;;  %p490_p4 = scmp.lt.s32.totalorder %s488_s25, %s484_s2 }
  0x40   : > { %p486_p0 = pnand %p485_p13, %p758_p5 }
  0x42   : > { %p487_p1 = pneg %p486_p0 }
  0x44   : > { %p492_p6 = pnand %p490_p4, %p487_p1 }
  0x46   : > { %495 = shalt.err (!%p492_p6)
}
  0x47   : > { %s622_s20 = smov 128   ;;  %s623_s26 = smov 8  }
  0x48   : > { %136 = dma.hbm_to_vmem [thread:$0]  (%p758_p5), %s769_s9, %s345_s18, %s131_s15, %s755_s27, %s622_s20, %s622_s20, %s623_s26  }
  0x49 PF: > { %p346_p7 = scmp.ge.s32.totalorder %s619_s16, 1  ;;  %p138_p8 = scmp.lt.s32.totalorder %s619_s16, 5 }
  0x4b   : > { %p139_p10 = pnand %p346_p7, %p138_p8 }
  0x4c   : > { %s144_s23 = sand.u32 (!%p139_p10), 1, %s595_s10  }
  0x4d   : > { %142 = sbr.rel (%p139_p10) target bundleno = 151 (0x97), region = 24  ;;  %s347_s22 = sshll.u32 (!%p139_p10), %s144_s23, 5 }
  0x4e   : > { %s145_s29 = scalar_lea.sflag (!%p139_p10), [#allocation3], %s144_s23  ;;  %s148_s19 = scalar_lea.vmem (!%p139_p10), [#allocation2], %s347_s22 }
  0x52   : > { %570 = dma.done.wait (%p719_p9), %s145_s29, 512  }
  0x53   : > { %572 = vsyncadd (%p719_p9), %s145_s29, 4294966784  ;;  %s165_s15 = sand.u32 1, %s583_s7   ;;  %p349_p5 = scmp.ne.s32.totalorder %s603_s12, 0 }
  0x54   : > { %s348_s21 = sshll.u32 %s165_s15, 3 }
  0x55   : > { %s802_s27 = scalar_lea.vmem [#allocation5], %s348_s21  ;;  %180 = sbr.rel (%p349_p5) target bundleno = 92 (0x5c), region = 32 }
  0x5a   : > { %v624_v0 = vmov 0.0  }
  0x5b   : > { %181 = vst [vmem:[%s802_s27] sm:$0xff] %v624_v0 }
  0x5c PF: > { %v182_v1 = vld [vmem:[%s148_s19] sm:$0xff]  ;;  %v183_v2 = vld [vmem:[%s148_s19 + $0x8] sm:$0xff]  ;;  %v184_v3 = vld [vmem:[%s148_s19 + $0x10] sm:$0xff]  ;;  %s350_s28 = sshll.u32 %s607_s13, 1 }
  0x5d   : > { %v185_v4 = vld [vmem:[%s148_s19 + $0x18] sm:$0xff]  ;;  %s187_s24 = sadd.s32 %s603_s12, %s350_s28 }
  0x5e   : > { %p351_p9 = scmp.ge.s32.totalorder %s187_s24, 3 }
  0x60   : > { %191 = sbr.rel (%p351_p9) target bundleno = 110 (0x6e), region = 36 }
  0x65   : > { %v193_v5 = vadd.f32 %v183_v2, %v182_v1  ;;  %v192_v7 = vld [vmem:[%s802_s27] sm:$0xff] }
  0x67   : > { %v194_v6 = vadd.f32 %v193_v5, %v184_v3 }
  0x69   : > { %v195_v8 = vadd.f32 %v194_v6, %v185_v4 }
  0x6b   : > { %v196_v9 = vadd.f32 %v195_v8, %v192_v7 }
  0x6d   : > { %197 = vst [vmem:[%s802_s27] sm:$0xff] %v196_v9 }
  0x6e PF: > { %p352_p11 = scmp.lt.s32.totalorder %s187_s24, 3 }
  0x6f   : > { %s353_s9 = sshll.u32 (!%p352_p11), %s187_s24, 5 }
  0x70   : > { %201 = sbr.rel (%p352_p11) target bundleno = 136 (0x88), region = 40 }
  0x75   : > { %v203_v10 = vlaneseq  ;;  %v208_v11 = vstv %s353_s9  ;;  %v229_v26 = vld [vmem:[%s802_s27] sm:$0xff] }
  0x77   : > { %v204_v12 = vshrl.u32 %v203_v10, 7 }
  0x79   : > { %v205_v13 = vadd.s32 8, %v204_v12  ;;  %v206_v14 = vadd.s32 16, %v204_v12  ;;  %v207_v15 = vadd.s32 24, %v204_v12  ;;  %v209_v16 = vadd.s32 %v208_v11, %v204_v12 }
  0x7b   : > { %v210_v17 = vadd.s32 %v208_v11, %v205_v13  ;;  %v211_v18 = vadd.s32 %v208_v11, %v206_v14  ;;  %v212_v19 = vadd.s32 %v208_v11, %v207_v15  ;;  %vm213_vm0 = vcmp.lt.s32.totalorder %v209_v16, 120 }
  0x7c   : > { %v225_v20 = vsel %vm213_vm0, %v182_v1, 0.0 }
  0x7d   : > { %vm214_vm1 = vcmp.lt.s32.totalorder %v210_v17, 120  ;;  %vm215_vm2 = vcmp.lt.s32.totalorder %v211_v18, 120  ;;  %vm216_vm3 = vcmp.lt.s32.totalorder %v212_v19, 120 }
  0x7e   : > { %v226_v21 = vsel %vm214_vm1, %v183_v2, 0.0  ;;  %v227_v22 = vsel %vm215_vm2, %v184_v3, 0.0  ;;  %v228_v24 = vsel %vm216_vm3, %v185_v4, 0.0 }
  0x7f   : > { %v230_v23 = vadd.f32 %v226_v21, %v225_v20 }
  0x81   : > { %v231_v25 = vadd.f32 %v230_v23, %v227_v22 }
  0x83   : > { %v232_v27 = vadd.f32 %v231_v25, %v228_v24 }
  0x85   : > { %v233_v28 = vadd.f32 %v232_v27, %v229_v26 }
  0x87   : > { %234 = vst [vmem:[%s802_s27] sm:$0xff] %v233_v28 }
  0x88 PF: > { %s355_s12 = sshll.u32 %s607_s13, 3  ;;  %s248_s25 = sshll.u32 %s802_s27, 4  ;;  %s249_s25 = int_to_ptr.vmem [resolvable:$true] %s248_s25 }
  0x89   : > { %s246_s17 = scalar_lea.hbm %s867_s1, %s355_s12  ;;  %s236_s26 = scalar_lea.sflag [#allocation4], %s165_s15 }
  0x8a   : > { %s250_s20 = sshll.u32 %s246_s17, 4  ;;  %s517_s13 = scalar_lea.hbm %s867_s1, 16  ;;  %s251_s20 = int_to_ptr.hbm [resolvable:$true] %s250_s20 }
  0x8b   : > { %s511_s23 = sshra.s32 %s251_s20, 4  ;;  %s512_s23 = int_to_ptr.hbm [resolvable:$true] %s511_s23 }
  0x8c   : > { %s513_s22 = scalar_lea.hbm %s512_s23, 8  ;;  %p518_p1 = scmp.lt.s32.totalorder %s512_s23, %s867_s1 }
  0x8d   : > { %p514_p12 = scmp.ne.s32.totalorder %s512_s23, %s513_s22  ;;  %p519_p4 = scmp.lt.s32.totalorder %s517_s13, %s513_s22 }
  0x8f   : > { %p515_p13 = pnand %p514_p12, %p739_p2  ;;  %p520_p6 = por %p519_p4, %p518_p1 }
  0x91   : > { %p516_p0 = pneg %p515_p13 }
  0x93   : > { %p521_p7 = pnand %p520_p6, %p516_p0 }
  0x95   : > { %524 = shalt.err (!%p521_p7)
}
  0x96   : > { %360 = dma.vmem_to_hbm [thread:$0]  (%p739_p2), %s249_s25, 128, %s251_s20, %s236_s26  }
  0x97 PF: > { %p366_p8 = scmp.ge.s32.totalorder %s619_s16, 2  ;;  %s262_s15 = sand.u32 1, %s579_s6  }
  0x98   : > { %s263_s27 = scalar_lea.sflag [#allocation4], %s262_s15 }
  0x99   : > { %p363_p10 = pnand %p366_p8, %p743_p3 }
  0x9b   : > { %p364_p5 = pneg %p363_p10 }
  0x9d   : > { %574 = dma.done.wait (%p364_p5), %s263_s27, 128  }
  0x9e   : > { %576 = vsyncadd (%p364_p5), %s263_s27, 4294967168  ;;  %s17_s16 = sadd.s32 1, %s619_s16   ;;  %s879_s13 = sld [smem:[#allocation8_spill]] }
  0x9f   : > { %p14_p9 = scmp.ge.s32.totalorder %s17_s16, 6   ;;  %s880_s4 = sld [smem:[#allocation9_spill]] }
  0xa0   : > { %s881_s15 = sld [smem:[#allocation10_spill]]  ;;  %s882_s6 = smov %s583_s7 }
  0xa1   : > { %s883_s7 = smov %s587_s8  ;;  %s884_s8 = smov %s725_s30 }
  0xa2   : > { %s885_s9 = smov %s595_s10  ;;  %s886_s10 = smov %s599_s11 }
  0xa3   : > { %s887_s11 = smov %s737_s3  ;;  %s888_s12 = smov %s611_s14 }
  0xa4   :  { %16 = sbr.rel (!%p14_p9) target bundleno = 9 (0x9), region = 81 }
  0xa5   : > { %s889_s14 = smov %s880_s4 }
  0xa9   :  { %269 = vsyncpa [#allocation3], 1 }
  0xaa   :  { %271 = vsyncpa [#allocation3 + $0x1], 1 }
  0xab   :  { %272 = vsyncpa [#allocation4], 1 }
  0xac   :  { %274 = vsyncpa [#allocation4 + $0x1], 1 }

</bundles_post_ra>
